<compile_context>
chip_gen: v6e
topology: v6e:2x2x1
jax: 0.10.0
libtpu: 0.0.40
codegen_flags: <defaults>
</compile_context>

<pallas_src>
import re

import jax
import jax.numpy as jnp
from jax import lax
from jax.experimental import pallas as pl
from jax.experimental.pallas import tpu as pltpu  # noqa: F401  (kept for TPU-specific extensions)

KEYWORDS = ('on', 'in', 'to', 'into', 'from')   # same keyword set as the module
VOCAB = 64
EMB = 32
HIDDEN = 32


def _round_up(x, m):
    return (x + m - 1) // m * m


# ---------------------------------------------------------------------------
# Language glue (pure Python / plain JAX — mirrors transport() language parsing)
# ---------------------------------------------------------------------------
def _parse_lang(l):
    sentence = re.sub(r'^\S+\s*', '', l)
    pattern = r'\b(' + '|'.join(KEYWORDS) + r')\b'
    match = re.search(pattern, sentence)
    if match:
        l = sentence[:match.start()].strip()
    return l


def _tokenize(l):
    # deterministic toy tokenizer: hash each word into a fixed vocab
    toks = []
    for w in l.lower().split():
        h = 0
        for ch in w:
            h = (h * 31 + ord(ch)) % VOCAB
        toks.append(h)
    if not toks:
        toks = [0]
    return jnp.asarray(toks, dtype=jnp.int32)


# ---------------------------------------------------------------------------
# Deterministic parameter init (synthetic weights, shapes implied by the module)
# ---------------------------------------------------------------------------
def init_params(cin, hidden=HIDDEN, emb=EMB, vocab=VOCAB):
    key = jax.random.PRNGKey(0)
    ks = jax.random.split(key, 8)
    s = 0.1
    return {
        'emb': jax.random.normal(ks[0], (vocab, emb), jnp.float32) * s,
        'w1':  jax.random.normal(ks[1], (cin, hidden), jnp.float32) * s,   # 1x1 conv Cin->D
        'b1':  jnp.zeros((1, hidden), jnp.float32),
        'wg':  jax.random.normal(ks[2], (emb, hidden), jnp.float32) * s,   # lang -> gamma
        'bg':  jnp.ones((1, hidden), jnp.float32),
        'wb':  jax.random.normal(ks[3], (emb, hidden), jnp.float32) * s,   # lang -> beta
        'bb':  jnp.zeros((1, hidden), jnp.float32),
        'w2':  jax.random.normal(ks[4], (hidden, 1), jnp.float32) * s,     # 1x1 conv D->1
        'b2':  jnp.zeros((1, 1), jnp.float32),
    }


# ---------------------------------------------------------------------------
# Fused Pallas kernel: 1x1conv -> ReLU -> (FiLM-folded) 1x1conv -> global softmax
# ---------------------------------------------------------------------------
def _make_fused_kernel(n_valid, p_pad, apply_softmax):
    """All closed-over values are Python scalars (no captured jax arrays)."""
    need_mask = apply_softmax and (n_valid != p_pad)

    def kernel(x_ref, w1t_ref, bw_ref, o_ref):
        # MXU: (D, C) @ (C, P_pad), bf16 in, f32 accumulate.  The tiny K=C
        # contraction stays on the MXU (free slot) — the VALU is the limiter.
        h = jnp.dot(w1t_ref[...], x_ref[...],
                    preferred_element_type=jnp.float32)          # (D, P_pad) f32
        bw = bw_ref[...]                 # (D, 2) f32: col 0 = b1, col 1 = gamma-folded w2
        h = jnp.maximum(h + bw[:, 0:1], 0.0)                     # bias + ReLU (VPU, f32)
        # Final 1-channel projection: VPU multiply + sublane (XLU) reduction.
        # FiLM gamma is folded into bw[:,1]; the constant (beta@w2 + b2) term is
        # softmax-shift-invariant and added on the host only for the raw path.
        logits = jnp.sum(h * bw[:, 1:2], axis=0, keepdims=True)  # (1, P_pad)

        if not apply_softmax:
            o_ref[...] = logits
            return

        if need_mask:
            # Only emitted when P != P_pad (compile-time branch): mask padded
            # pixel columns so they contribute 0 to the global softmax.
            col = lax.broadcasted_iota(jnp.int32, (1, p_pad), 1)
            logits = jnp.where(col < n_valid, logits, -1e30)

        # Fused global softmax over all (valid) spatial positions — exact f32
        # normalization so probabilities sum to 1.
        m = jnp.max(logits, axis=-1, keepdims=True)              # (1, 1)
        e = jnp.exp(logits - m)                                  # (1, P_pad)
        s = jnp.sum(e, axis=-1, keepdims=True)                   # (1, 1)
        o_ref[...] = e * (1.0 / s)

    return kernel


def attend_softmax_pallas(x_cp, w1t, bw, n_valid, apply_softmax):
    """Single whole-image-resident pallas_call.

    x_cp : (C, P_pad) bf16   channels-first image, pixel axis padded to mult of 128
    w1t  : (D, C)     bf16   first 1x1 conv, transposed
    bw   : (D, 2)     f32    [b1 | gamma-folded w2]
    returns (1, P_pad) f32 probabilities (softmax) or raw logits.
    """
    C, P_pad = x_cp.shape
    D = w1t.shape[0]
    kernel = _make_fused_kernel(n_valid, P_pad, apply_softmax)

    return pl.pallas_call(
        kernel,
        out_shape=jax.ShapeDtypeStruct((1, P_pad), jnp.float32),
        grid=(1,),
        in_specs=[
            pl.BlockSpec((C, P_pad), lambda i: (0, 0)),   # whole image (channels-first)
            pl.BlockSpec((D, C),     lambda i: (0, 0)),   # w1^T (bf16)
            pl.BlockSpec((D, 2),     lambda i: (0, 0)),   # merged b1 / folded-w2
        ],
        out_specs=pl.BlockSpec((1, P_pad), lambda i: (0, 0)),
    )(x_cp, w1t, bw)


# ---------------------------------------------------------------------------
# Forward pass (mirrors OneStreamTransportUnetr.forward's single-stream tail:
# language-conditioned FCN logits -> flatten -> global softmax -> reshape)
# ---------------------------------------------------------------------------
def one_stream_transport_unetr_forward(inp_img, lang_goal, params, softmax=True):
    H, W, C = inp_img.shape
    P = H * W
    P_pad = _round_up(P, 128)

    # transport(): strip the first word, cut the sentence at the first keyword,
    # embed language and map to FiLM (gamma, beta).
    l = _parse_lang(lang_goal)
    toks = _tokenize(l)
    lvec = jnp.mean(params['emb'][toks], axis=0, keepdims=True)   # (1, EMB)
    gamma = lvec @ params['wg'] + params['bg']                    # (1, HIDDEN)
    beta = lvec @ params['wb'] + params['bb']                     # (1, HIDDEN)

    # Fold FiLM into the final projection (exact):
    #   (relu(z)*gamma + beta) @ w2 + b2 == relu(z) @ (gamma.T*w2) + (beta@w2 + b2)
    w2c = (gamma.T * params['w2']).astype(jnp.float32)            # (HIDDEN, 1)
    b2f = beta @ params['w2'] + params['b2']                      # (1, 1) constant

    # channels-first, lane-dense layout; bf16 cast BEFORE transpose/pad to halve
    # host-side layout traffic.
    # TODO(synk): ideally the upstream stream would hand us a CHW bf16 image and
    # skip this transpose entirely.
    x = inp_img.astype(jnp.bfloat16).reshape(P, C).T              # (C, P) bf16
    x = jnp.pad(x, ((0, 0), (0, P_pad - P)))                      # (C, P_pad) bf16
    w1t = params['w1'].T.astype(jnp.bfloat16)                     # (HIDDEN, C) bf16
    bw = jnp.concatenate([params['b1'].T, w2c], axis=1)           # (HIDDEN, 2) f32

    out = attend_softmax_pallas(x, w1t, bw, P, softmax)           # (1, P_pad)

    if softmax:
        return out[:, :P].reshape(H, W, 1)
    # raw-logits path: add back the (softmax-invariant) constant term exactly,
    # and return the same spatial shape as the softmax path.
    return (out[:, :P] + b2f).reshape(H, W, 1)


if __name__ == "__main__":
    C = 4
    params = init_params(C)
    lang_goal = "pack the red block into the brown box"
    key = jax.random.PRNGKey(0)
    k1, k2 = jax.random.split(key)

    # Case 1: small square image (P multiple of 128 -> no padding mask emitted).
    H, W = 16, 16
    inp_img = jax.random.normal(k1, (H, W, C), jnp.float32)
    out = one_stream_transport_unetr_forward(inp_img, lang_goal, params, softmax=True)
    out = jax.block_until_ready(out)
    assert out.shape == (H, W, 1), out.shape
    assert abs(float(jnp.sum(out)) - 1.0) < 1e-4   # global softmax sums to 1

    # Case 2: P NOT a multiple of 128 — exercises padding + masked softmax.
    H2, W2 = 10, 12
    inp_img2 = jax.random.normal(k2, (H2, W2, C), jnp.float32)
    out2 = one_stream_transport_unetr_forward(inp_img2, lang_goal, params, softmax=True)
    out2 = jax.block_until_ready(out2)
    assert out2.shape == (H2, W2, 1), out2.shape
    assert abs(float(jnp.sum(out2)) - 1.0) < 1e-4

    # Raw-logits path: same spatial shape as the softmax path.
    raw = one_stream_transport_unetr_forward(inp_img, lang_goal, params, softmax=False)
    raw = jax.block_until_ready(raw)
    assert raw.shape == (H, W, 1), raw.shape

    print("KERNEL_OK")
</pallas_src>

<mosaic_0001>
module attributes {stable_mosaic.version = 11 : i64} {
  func.func @kernel(%arg0: i32, %arg1: memref<4x256xbf16, #tpu.memory_space<vmem>>, %arg2: memref<32x4xbf16, #tpu.memory_space<vmem>>, %arg3: memref<32x2xf32, #tpu.memory_space<vmem>>, %arg4: memref<1x256xf32, #tpu.memory_space<vmem>>) attributes {dimension_semantics = [#tpu.dimension_semantics<arbitrary>], iteration_bounds = array<i64: 1>, scalar_prefetch = 0 : i64, scratch_operands = 0 : i64, tpu.core_type = #tpu.core_type<tc>, window_params = [{pipeline_mode = #tpu.pipeline_mode<synchronous>, transform_indices = @transform_0, window_bounds = array<i64: 4, 256>}, {pipeline_mode = #tpu.pipeline_mode<synchronous>, transform_indices = @transform_1, window_bounds = array<i64: 32, 4>}, {pipeline_mode = #tpu.pipeline_mode<synchronous>, transform_indices = @transform_2, window_bounds = array<i64: 32, 2>}, {pipeline_mode = #tpu.pipeline_mode<synchronous>, transform_indices = @transform_3, window_bounds = array<i64: 1, 256>}]} {
    %c0 = arith.constant 0 : index
    %c0_0 = arith.constant 0 : index
    %0 = vector.load %arg2[%c0, %c0_0] : memref<32x4xbf16, #tpu.memory_space<vmem>>, vector<32x4xbf16>
    %c0_1 = arith.constant 0 : index
    %c0_2 = arith.constant 0 : index
    %1 = vector.load %arg1[%c0_1, %c0_2] : memref<4x256xbf16, #tpu.memory_space<vmem>>, vector<4x256xbf16>
    %cst = arith.constant dense<0.000000e+00> : vector<32x256xf32>
    %2 = tpu.matmul %0, %1, %cst {dimension_numbers = #tpu.dot_dimension_numbers<[1], [0], [0], [1], [0, 0, 1, 1], [], []>} : vector<32x4xbf16>, vector<4x256xbf16>, vector<32x256xf32> -> vector<32x256xf32>
    %c0_3 = arith.constant 0 : index
    %c0_4 = arith.constant 0 : index
    %3 = vector.load %arg3[%c0_3, %c0_4] : memref<32x2xf32, #tpu.memory_space<vmem>>, vector<32x2xf32>
    %4 = vector.extract_strided_slice %3 {offsets = [0, 0], sizes = [32, 1], strides = [1, 1]} : vector<32x2xf32> to vector<32x1xf32>
    %5 = vector.broadcast %4 : vector<32x1xf32> to vector<32x256xf32>
    %6 = arith.addf %2, %5 : vector<32x256xf32>
    %cst_5 = arith.constant 0.000000e+00 : f32
    %7 = vector.broadcast %cst_5 : f32 to vector<32x256xf32>
    %8 = arith.maximumf %6, %7 : vector<32x256xf32>
    %9 = vector.extract_strided_slice %3 {offsets = [0, 1], sizes = [32, 1], strides = [1, 1]} : vector<32x2xf32> to vector<32x1xf32>
    %10 = vector.broadcast %9 : vector<32x1xf32> to vector<32x256xf32>
    %11 = arith.mulf %8, %10 : vector<32x256xf32>
    %cst_6 = arith.constant dense<0.000000e+00> : vector<256xf32>
    %12 = vector.multi_reduction <add>, %11, %cst_6 [0] : vector<32x256xf32> to vector<256xf32>
    %13 = vector.shape_cast %12 : vector<256xf32> to vector<1x256xf32>
    %cst_7 = arith.constant dense<0xFF800000> : vector<1xf32>
    %14 = vector.multi_reduction <maximumf>, %13, %cst_7 [1] : vector<1x256xf32> to vector<1xf32>
    %15 = vector.shape_cast %14 : vector<1xf32> to vector<1x1xf32>
    %16 = vector.broadcast %15 : vector<1x1xf32> to vector<1x256xf32>
    %17 = arith.subf %13, %16 : vector<1x256xf32>
    %18 = math.exp %17 : vector<1x256xf32>
    %cst_8 = arith.constant dense<0.000000e+00> : vector<1xf32>
    %19 = vector.multi_reduction <add>, %18, %cst_8 [1] : vector<1x256xf32> to vector<1xf32>
    %20 = vector.shape_cast %19 : vector<1xf32> to vector<1x1xf32>
    %cst_9 = arith.constant 1.000000e+00 : f32
    %21 = vector.broadcast %cst_9 : f32 to vector<1x1xf32>
    %22 = arith.divf %21, %20 : vector<1x1xf32>
    %23 = vector.broadcast %22 : vector<1x1xf32> to vector<1x256xf32>
    %24 = arith.mulf %18, %23 : vector<1x256xf32>
    %c0_10 = arith.constant 0 : index
    %c0_11 = arith.constant 0 : index
    %25 = vector.load %arg4[%c0_10, %c0_11] : memref<1x256xf32, #tpu.memory_space<vmem>>, vector<1x256xf32>
    tpu.vector_store %arg4[%c0_10, %c0_11], %24 {strides = array<i32>} : memref<1x256xf32, #tpu.memory_space<vmem>>, vector<1x256xf32>,
    return
  }
  func.func @transform_0(%arg0: i32) -> (i32, i32) {
    %c0_i32 = arith.constant 0 : i32
    %c0_i32_0 = arith.constant 0 : i32
    %c0_i32_1 = arith.constant 0 : i32
    return %c0_i32, %c0_i32_0 : i32, i32
  }
  func.func @transform_1(%arg0: i32) -> (i32, i32) {
    %c0_i32 = arith.constant 0 : i32
    %c0_i32_0 = arith.constant 0 : i32
    %c0_i32_1 = arith.constant 0 : i32
    return %c0_i32, %c0_i32_0 : i32, i32
  }
  func.func @transform_2(%arg0: i32) -> (i32, i32) {
    %c0_i32 = arith.constant 0 : i32
    %c0_i32_0 = arith.constant 0 : i32
    %c0_i32_1 = arith.constant 0 : i32
    return %c0_i32, %c0_i32_0 : i32, i32
  }
  func.func @transform_3(%arg0: i32) -> (i32, i32) {
    %c0_i32 = arith.constant 0 : i32
    %c0_i32_0 = arith.constant 0 : i32
    %c0_i32_1 = arith.constant 0 : i32
    return %c0_i32, %c0_i32_0 : i32, i32
  }
}

</mosaic_0001>

<bundles_post_ra>
// kernel: tpu_custom_call.1
= control target key start
LH: loop header
LB: loop body
LE: loop exit
PB: predicated region body
PF: predicated region fallthrough
CT: control target
= control target key end

     0   :  { %vm71_vm0 = vcmask 1041408   ;;  %v280_v3 = vmov 0   ;;  %vm64_vm1 = vcmask 31744   ;;  %s328_s0 = inlined_call_operand.vmem [shape: bf16[4,256], index: 0, kind: input, shape index: {}]   ;;  %s329_s1 = inlined_call_operand.vmem [shape: bf16[32,4], index: 1, kind: input, shape index: {}]   ;;  %s330_s2 = inlined_call_operand.vmem [shape: f32[32,2], index: 2, kind: input, shape index: {}]   ;;  %s331_s3 = inlined_call_operand.hbm [shape: f32[1,256], index: 3, kind: output, shape index: {}]  }
   0x1   :  { %v236_v0 = vld.sshfl [vmem:[%s328_s0] sm:$0x33 pattern:$0x76325410]  ;;  %110 = vmatprep.mubr.bf16.mxu0 %v280_v3  ;;  %120 = vmatprep.mubr.bf16.mxu1 %v280_v3  ;;  %v251_v5 = vld [vmem:[%s329_s1 + $0x8] sm:$0xff]   ;;  %v23_v6 = vld [vmem:[%s330_s2 + $0x10] sm:$0xff] }
   0x2   :  { %v63_v1 = vcombine.high %v236_v0, %v236_v0  ;;  %v73_v2 = vsel %vm71_vm0, %v236_v0, 0  ;;  %v250_v4 = vld [vmem:[%s329_s1] sm:$0xff]   ;;  %247 = vset.pattern.permute.xlu1 %v280_v3  ;;  %246 = vset.pattern.permute.xlu0 %v280_v3 }
   0x3   :  { %v21_v7 = vld [vmem:[%s330_s2] sm:$0xff] }
   0x4   :  { %237 = vmatprep.subr.msk.bf16.mxu0 %vm71_vm0, %v63_v1  ;;  %240 = vmatprep.subr.msk.bf16.mxu1 %vm71_vm0, %v63_v1 }
   0x5   :  { %93 = vmatpush1.bf16.msra.mxu0 %v73_v2  ;;  %241 = vmatpush1.bf16.msra.mxu1 %v73_v2 }
   0x6   :  { %8 = vsyncpa [#allocation3], 0  ;;  %37 = vperm.xlu1 %247, %v23_v6   ;;  %27 = vperm.xlu0 %246, %v21_v7   ;;  %v24_v8 = vld [vmem:[%s330_s2 + $0x18] sm:$0xff]  ;;  %v22_v9 = vld [vmem:[%s330_s2 + $0x8] sm:$0xff]  ;;  %v281_v10 = vmov 1   ;;  %s283_s2 = smov [#allocation2]  }
   0x7   :  { %s226_s24 = sshll.u32 %s283_s2, 4  ;;  %s227_s24 = int_to_ptr.vmem [resolvable:$true] %s226_s24 }
   0x8   :  { %238 = vmatmul.mubr.msk.bf16.vlgmr.msra.gmra.mxu0 %vm64_vm1, %v250_v4  ;;  %239 = vmatmul.mubr.msk.bf16.vlgmr.msra.gmra.mxu1 %vm64_vm1, %v251_v5  ;;  %s258_s25 = scalar_lea.vmem %s227_s24, 32  ;;  %p263_p1 = scmp.lt.s32.totalorder %s227_s24, %s227_s24 }
   0x9   :  { %p259_p0 = scmp.ne.s32.totalorder %s227_s24, %s258_s25  ;;  %p264_p2 = scmp.lt.s32.totalorder %s258_s25, %s258_s25 }
   0xa   :  { %42 = vperm.xlu1 %247, %v24_v8   ;;  %32 = vperm.xlu0 %246, %v22_v9  }
   0xb   :  { %p265_p3 = por %p264_p2, %p263_p1 }
   0xd   :  { %p266_p4 = pnand %p265_p3, %p259_p0 }
   0xe   :  { %249 = vset.pattern.permute.xlu1 %v281_v10  ;;  %248 = vset.pattern.permute.xlu0 %v281_v10 }
   0xf   :  { %144 = vperm.xlu1 %249, %v22_v9   ;;  %140 = vperm.xlu0 %248, %v21_v7  }
  0x13   :  { %148 = vperm.xlu1 %249, %v23_v6   ;;  %152 = vperm.xlu0 %248, %v24_v8  }
  0x81   :  { %v38_v11 = vpop.permute.xlu1 %37  ;;  %v28_v12 = vpop.permute.xlu0 %27 }
  0x85   :  { %v43_v13 = vpop.permute.xlu1 %42  ;;  %v33_v14 = vpop.permute.xlu0 %32 }
  0x8a   :  { %v145_v20 = vpop.permute.xlu1 %144  ;;  %v141_v26 = vpop.permute.xlu0 %140 }
  0x8e   :  { %v149_v38 = vpop.permute.xlu1 %148  ;;  %v153_v46 = vpop.permute.xlu0 %152 }
  0xc8   :  { %v112_v15 = vpop.f32.mrf.mxu0  ;;  %v122_v16 = vpop.f32.mrf.mxu1 }
  0xc9   :  { %v113_v17 = vadd.f32 %v112_v15, %v28_v12  ;;  %v123_v22 = vadd.f32 %v122_v16, %v38_v11  ;;  %v282_v15 = vmov 1966171168  }
  0xca   :  { %v114_v18 = vpop.f32.mrf.mxu0  ;;  %v124_v19 = vpop.f32.mrf.mxu1  ;;  %v201_v16 = vunpack.c.l.s4 %v282_v15 }
  0xcb   :  { %v115_v21 = vadd.f32 %v114_v18, %v28_v12  ;;  %v125_v25 = vadd.f32 %v124_v19, %v38_v11  ;;  %v131_v27 = vmax.f32 %v113_v17, 0.0  ;;  %v135_v35 = vmax.f32 %v123_v22, 0.0 }
  0xcc   :  { %v116_v23 = vpop.f32.mrf.mxu0  ;;  %v126_v24 = vpop.f32.mrf.mxu1  ;;  %v203_v17 = vlaneseq  ;;  %v202_v18 = vunpack.c.0.s8 %v201_v16 }
  0xcd   :  { %v117_v28 = vadd.f32 %v116_v23, %v33_v14  ;;  %v127_v29 = vadd.f32 %v126_v24, %v43_v13  ;;  %v132_v32 = vmax.f32 %v115_v21, 0.0  ;;  %v136_v37 = vmax.f32 %v125_v25, 0.0 }
  0xce   :  { %v118_v30 = vpop.f32.mrf.mxu0  ;;  %v128_v31 = vpop.f32.mrf.mxu1  ;;  %v155_v40 = vmul.f32 %v141_v26, %v131_v27  ;;  %v159_v47 = vmul.f32 %v149_v38, %v135_v35  ;;  %v204_v19 = vshrl.u32 %v203_v17, 7  ;;  %vm217_vm2 = vcmp.lt.s32.totalorder %v203_v17, 256 }
  0xcf   :  { %v119_v33 = vadd.f32 %v118_v30, %v33_v14  ;;  %v129_v34 = vadd.f32 %v128_v31, %v43_v13  ;;  %v133_v36 = vmax.f32 %v117_v28, 0.0  ;;  %v137_v42 = vmax.f32 %v127_v29, 0.0 }
  0xd0   :  { %v156_v43 = vmul.f32 %v141_v26, %v132_v32  ;;  %v160_v49 = vmul.f32 %v149_v38, %v136_v37  ;;  %v205_v23 = vsub.s32 %v202_v18, %v204_v19 }
  0xd1   :  { %v134_v39 = vmax.f32 %v119_v33, 0.0  ;;  %v157_v41 = vmul.f32 %v145_v20, %v133_v36  ;;  %v138_v45 = vmax.f32 %v129_v34, 0.0  ;;  %v161_v51 = vmul.f32 %v153_v46, %v137_v42 }
  0xd3   :  { %v158_v44 = vmul.f32 %v145_v20, %v134_v39  ;;  %v163_v48 = vadd.f32 %v157_v41, %v155_v40  ;;  %v162_v53 = vmul.f32 %v153_v46, %v138_v45 }
  0xd5   :  { %v172_v50 = vadd.f32 %v158_v44, %v156_v43  ;;  %v164_v52 = vadd.f32 %v163_v48, %v159_v47 }
  0xd7   :  { %v173_v54 = vadd.f32 %v172_v50, %v160_v49  ;;  %v165_v55 = vadd.f32 %v164_v52, %v161_v51 }
  0xd9   :  { %v174_v56 = vadd.f32 %v173_v54, %v162_v53  ;;  %v166_v57 = vrot.slane %v165_v55, 4 }
  0xdb   :  { %v175_v58 = vrot.slane %v174_v56, 4  ;;  %v167_v59 = vadd.f32 %v166_v57, %v165_v55 }
  0xdd   :  { %v176_v60 = vadd.f32 %v175_v58, %v174_v56  ;;  %v168_v61 = vrot.slane %v167_v59, 2 }
  0xdf   :  { %v177_v62 = vrot.slane %v176_v60, 2  ;;  %v169_v63 = vadd.f32 %v168_v61, %v167_v59 }
  0xe1   :  { %v178_v0 = vadd.f32 %v177_v62, %v176_v60  ;;  %v170_v1 = vrot.slane %v169_v63, 1 }
  0xe3   :  { %v179_v2 = vrot.slane %v178_v0, 1  ;;  %v171_v3 = vadd.f32 %v170_v1, %v169_v63 }
  0xe5   :  { %v180_v4 = vadd.f32 %v179_v2, %v178_v0 }
  0xe7   :  { %v181_v5 = vmax.f32 %v171_v3, %v180_v4 }
  0xe9   :  { %182 = vmax.xlane.f32.xlu1 %v181_v5 }
 0x172   :  { %v183_v6 = vpop.xlane.xlu1 %182 }
 0x173   :  { %v184_v7 = vsub.f32 %v171_v3, %v183_v6  ;;  %v185_v8 = vsub.f32 %v180_v4, %v183_v6 }
 0x175   :  { %v186_v9 = vmul.f32 1.442695, %v184_v7  ;;  %v188_v10 = vmul.f32 1.442695, %v185_v8 }
 0x177   :  { %252 = vpow2.f32 %v186_v9 }
 0x178   :  { %254 = vpow2.f32 %v188_v10 }
 0x184   :  { %v253_v11 = vpop.eup %252 }
 0x185   :  { %v255_v12 = vpop.eup %254 }
 0x186   :  { %v190_v13 = vadd.f32 %v255_v12, %v253_v11 }
 0x188   :  { %191 = vadd.xlane.f32.xlu0 %v190_v13 }
 0x211   :  { %v192_v14 = vpop.xlane.xlu0 %191 }
 0x212   :  { %256 = vrcp.f32 %v192_v14 }
 0x21f   :  { %v257_v20 = vpop.eup %256 }
 0x220   :  { %v195_v21 = vmul.f32 %v257_v20, %v253_v11  ;;  %v196_v22 = vmul.f32 %v257_v20, %v255_v12 }
 0x222   :  { %v199_v24 = vcombine.low %v195_v21, %v196_v22 }
 0x224   :  { %v206_v25 = vrot.slane %v199_v24, %v205_v23 }
 0x226   :  { %v213_v26 = vrot.slane %v206_v25, %v205_v23 }
 0x228   :  { %219 = vst.msk [vmem:[#allocation2] sm:$0x3] %vm217_vm2, %v213_v26 }
 0x229   :  { %269 = shalt.err (!%p266_p4)
}
 0x22a   :  { %229 = dma.vmem_to_hbm [thread:$0]  %s227_s24, 32, %s331_s3, [#allocation3]  }
 0x22b   :  { %278 = dma.done.wait [#allocation3], 32  }
 0x22c   :  { %279 = vsyncadd [#allocation3], 4294967264 }
 0x22d   :  { %233 = vsyncpa [#allocation3], 1 }

</bundles_post_ra>
